<compile_context>
chip_gen: v6e
topology: v6e:2x2x1
jax: 0.10.0
libtpu: 0.0.40
codegen_flags: <defaults>
</compile_context>

<pallas_src>
import jax
import jax.numpy as jnp
from jax.experimental import pallas as pl
from jax.experimental.pallas import tpu as pltpu


def _round_up(x: int, m: int) -> int:
    return (x + m - 1) // m * m


def mlp_kernel(x_ref, w1t_ref, w2t_ref, o_ref):
    # x_ref:   (TILE_N, input_dim)       row tile of the input
    # w1t_ref: (input_dim, hidden_dim)   W1 pre-transposed (feeds MXU directly)
    # w2t_ref: (hidden_dim, output_dim)  W2 pre-transposed
    # o_ref:   (TILE_N, output_dim)
    x = x_ref[...]

    # Layer 1: x @ W1^T with f32 accumulation, ReLU on the VPU in f32.
    h = jnp.dot(x, w1t_ref[...], preferred_element_type=jnp.float32)
    h = jnp.maximum(h, jnp.float32(0.0))

    # Layer 2: h @ W2^T.  astype is a no-op for f32 weights; it only matters
    # when weights are stored in bf16 (bf16 x bf16 -> f32 on the MXU).
    out = jnp.dot(h.astype(w2t_ref.dtype), w2t_ref[...],
                  preferred_element_type=jnp.float32)
    o_ref[...] = out.astype(o_ref.dtype)


def prepare_mlp_params(w1, w2, *, param_dtype=None):
    """One-time parameter prep (call once at init, NOT per forward).

    w1: (hidden_dim, input_dim), w2: (output_dim, hidden_dim) — the PyTorch
    nn.Linear (out_features, in_features) layout.  Returns (w1t, w2t) in
    (in_features, out_features) layout so the kernel never transposes.
    Optionally cast to bf16 (v6e/v7x) to halve resident-weight VMEM and the
    one-time weight DMA.
    """
    if param_dtype is not None:
        w1 = w1.astype(param_dtype)
        w2 = w2.astype(param_dtype)
    return jnp.asarray(w1.T), jnp.asarray(w2.T)


def mlp_forward(x, w1t, w2t, *, tile_n: int = 512):
    """x: (N, input_dim); w1t: (input_dim, hidden_dim); w2t: (hidden_dim,
    output_dim) (from prepare_mlp_params).  Returns (N, output_dim)."""
    n, input_dim = x.shape
    k1, hidden_dim = w1t.shape
    k2, output_dim = w2t.shape
    assert k1 == input_dim and k2 == hidden_dim

    itemsize = x.dtype.itemsize
    w_itemsize = jnp.dtype(w1t.dtype).itemsize
    # Sublane alignment for the row tile: 8 rows for 32-bit, 16 for 16-bit.
    row_align = 8 if itemsize >= 4 else 16

    # Resident-weight footprint.  Single-buffer the weight BlockSpecs when
    # they are large (constant index_map needs no double buffer) so a tiling
    # that compiles on v5e/v6e (128 MiB VMEM) does not OOM on v7x (64 MiB).
    w_bytes = (w1t.size + w2t.size) * w_itemsize
    single_buffer_weights = w_bytes > (8 << 20)
    w_buf = 1 if single_buffer_weights else 2

    def step_bytes(t):
        # double-buffered x/out streams + f32 intermediate + resident weights
        return (2 * t * (input_dim + output_dim) * itemsize
                + t * hidden_dim * 4
                + w_buf * w_bytes)

    # Cap the row tile from the VMEM budget (stay well under v7x's 64 MiB).
    vmem_budget = 40 << 20
    while tile_n > 256 and step_bytes(tile_n) > vmem_budget:
        tile_n //= 2

    if n <= tile_n:
        # Small-N: use >=2 row tiles when possible so the "parallel" grid axis
        # can shard across v7x's two TensorCores (no effect on v5e/v6e).
        n_tiles = 2 if n >= 2 * row_align else 1
        tile_n = _round_up(pl.cdiv(n, n_tiles), row_align)
    n_pad = _round_up(n, tile_n)
    grid = (n_pad // tile_n,)

    # Fast path: no padding copy when N is already a tile multiple.  Feature
    # dims are never padded (full-dim blocks satisfy the (8,128) rule and the
    # MXU pads K internally), so x / w1t / w2t go straight to the kernel.
    if n_pad != n:
        xp = jnp.zeros((n_pad, input_dim), dtype=x.dtype).at[:n].set(x)
    else:
        xp = x

    if single_buffer_weights:
        w1t_spec = pl.BlockSpec((input_dim, hidden_dim), lambda i: (0, 0),
                                pipeline_mode=pl.Buffered(1))
        w2t_spec = pl.BlockSpec((hidden_dim, output_dim), lambda i: (0, 0),
                                pipeline_mode=pl.Buffered(1))
    else:
        w1t_spec = pl.BlockSpec((input_dim, hidden_dim), lambda i: (0, 0))
        w2t_spec = pl.BlockSpec((hidden_dim, output_dim), lambda i: (0, 0))

    # v5e's scoped-VMEM default is only 16 MiB; raise it explicitly so the
    # larger row tile / resident weights fit (clamped to v7x's 64 MiB).
    vmem_limit = int(min(max(32 << 20, 2 * step_bytes(tile_n) + (8 << 20)),
                         64 << 20))

    # Advisory cost from the true (unpadded) dims.
    flops = 2 * n * (input_dim * hidden_dim + hidden_dim * output_dim)
    bytes_accessed = (n * (input_dim + output_dim) * itemsize + w_bytes)

    out_padded = pl.pallas_call(
        mlp_kernel,
        out_shape=jax.ShapeDtypeStruct((n_pad, output_dim), x.dtype),
        grid_spec=pltpu.PrefetchScalarGridSpec(
            num_scalar_prefetch=0,
            grid=grid,
            in_specs=[
                # x streams by row tile (double-buffered by the pipeline).
                # TODO(synk): try pipeline_mode=pl.Buffered(3) here if xprof
                # shows exposed DMA for very small K dims.
                pl.BlockSpec((tile_n, input_dim), lambda i: (i, 0)),
                # Weights: constant index_map -> DMA'd once, VMEM-resident.
                w1t_spec,
                w2t_spec,
            ],
            out_specs=pl.BlockSpec((tile_n, output_dim), lambda i: (i, 0)),
        ),
        compiler_params=pltpu.CompilerParams(
            # Row tiles are independent -> shard the grid across both
            # TensorCores on v7x.
            dimension_semantics=("parallel",),
            vmem_limit_bytes=vmem_limit,
        ),
        cost_estimate=pl.CostEstimate(
            flops=flops, transcendentals=0, bytes_accessed=bytes_accessed),
    )(xp, w1t, w2t)

    return out_padded[:n] if n_pad != n else out_padded


def _reference(x, w1, w2):
    return jnp.maximum(x @ w1.T, 0.0) @ w2.T


if __name__ == "__main__":
    key = jax.random.PRNGKey(0)
    kx, kw1, kw2, kx2, kx3 = jax.random.split(key, 5)

    # Small shapes consistent with the module's forward (GIN aggregator).
    N, INPUT_DIM, HIDDEN_DIM, OUTPUT_DIM = 8, 32, 64, 16

    x = jax.random.normal(kx, (N, INPUT_DIM), dtype=jnp.float32)
    # PyTorch Linear weight layout (out_features, in_features).
    w1 = jax.random.uniform(
        kw1, (HIDDEN_DIM, INPUT_DIM), dtype=jnp.float32,
        minval=-1.0 / INPUT_DIM**0.5, maxval=1.0 / INPUT_DIM**0.5)
    w2 = jax.random.uniform(
        kw2, (OUTPUT_DIM, HIDDEN_DIM), dtype=jnp.float32,
        minval=-1.0 / HIDDEN_DIM**0.5, maxval=1.0 / HIDDEN_DIM**0.5)

    # One-time weight prep (transpose to (in, out) layout), outside the hot path.
    w1t, w2t = prepare_mlp_params(w1, w2)
    fwd = jax.jit(mlp_forward)

    # 1) Tiny N, single row tile.
    out = jax.block_until_ready(fwd(x, w1t, w2t))
    ref = _reference(x, w1, w2)
    assert out.shape == (N, OUTPUT_DIM)
    assert jnp.allclose(out, ref, atol=1e-5, rtol=1e-5)

    # 2) N not a tile multiple: exercises the 2-row-tile split + N padding.
    N2 = 300
    x2 = jax.random.normal(kx2, (N2, INPUT_DIM), dtype=jnp.float32)
    out2 = jax.block_until_ready(fwd(x2, w1t, w2t))
    ref2 = _reference(x2, w1, w2)
    assert out2.shape == (N2, OUTPUT_DIM)
    assert jnp.allclose(out2, ref2, atol=1e-5, rtol=1e-5)

    # 3) N a multiple of the 512-row tile: zero-copy fast path, multi-tile grid.
    N3 = 1024
    x3 = jax.random.normal(kx3, (N3, INPUT_DIM), dtype=jnp.float32)
    out3 = jax.block_until_ready(fwd(x3, w1t, w2t))
    ref3 = _reference(x3, w1, w2)
    assert out3.shape == (N3, OUTPUT_DIM)
    assert jnp.allclose(out3, ref3, atol=1e-5, rtol=1e-5)

    print("KERNEL_OK")
</pallas_src>

<mosaic_0001>
module attributes {stable_mosaic.version = 11 : i64} {
  func.func @mlp_kernel(%arg0: i32, %arg1: memref<8x32xf32, #tpu.memory_space<vmem>>, %arg2: memref<32x64xf32, #tpu.memory_space<vmem>>, %arg3: memref<64x16xf32, #tpu.memory_space<vmem>>, %arg4: memref<8x16xf32, #tpu.memory_space<vmem>>) attributes {dimension_semantics = [#tpu.dimension_semantics<parallel>], iteration_bounds = array<i64: 1>, scalar_prefetch = 0 : i64, scratch_operands = 0 : i64, tpu.core_type = #tpu.core_type<tc>, window_params = [{transform_indices = @transform_0, window_bounds = array<i64: 8, 32>}, {pipeline_mode = #tpu.pipeline_mode<synchronous>, transform_indices = @transform_1, window_bounds = array<i64: 32, 64>}, {pipeline_mode = #tpu.pipeline_mode<synchronous>, transform_indices = @transform_2, window_bounds = array<i64: 64, 16>}, {transform_indices = @transform_3, window_bounds = array<i64: 8, 16>}]} {
    %c0 = arith.constant 0 : index
    %c0_0 = arith.constant 0 : index
    %0 = vector.load %arg1[%c0, %c0_0] : memref<8x32xf32, #tpu.memory_space<vmem>>, vector<8x32xf32>
    %c0_1 = arith.constant 0 : index
    %c0_2 = arith.constant 0 : index
    %1 = vector.load %arg2[%c0_1, %c0_2] : memref<32x64xf32, #tpu.memory_space<vmem>>, vector<32x64xf32>
    %cst = arith.constant dense<0.000000e+00> : vector<8x64xf32>
    %2 = tpu.matmul %0, %1, %cst {dimension_numbers = #tpu.dot_dimension_numbers<[1], [0], [0], [1], [0, 0, 1, 1], [], []>} : vector<8x32xf32>, vector<32x64xf32>, vector<8x64xf32> -> vector<8x64xf32>
    %cst_3 = arith.constant 0.000000e+00 : f32
    %3 = vector.broadcast %cst_3 : f32 to vector<8x64xf32>
    %4 = arith.maximumf %2, %3 : vector<8x64xf32>
    %c0_4 = arith.constant 0 : index
    %c0_5 = arith.constant 0 : index
    %5 = vector.load %arg3[%c0_4, %c0_5] : memref<64x16xf32, #tpu.memory_space<vmem>>, vector<64x16xf32>
    %cst_6 = arith.constant dense<0.000000e+00> : vector<8x16xf32>
    %6 = tpu.matmul %4, %5, %cst_6 {dimension_numbers = #tpu.dot_dimension_numbers<[1], [0], [0], [1], [0, 0, 1, 1], [], []>} : vector<8x64xf32>, vector<64x16xf32>, vector<8x16xf32> -> vector<8x16xf32>
    %c0_7 = arith.constant 0 : index
    %c0_8 = arith.constant 0 : index
    %7 = vector.load %arg4[%c0_7, %c0_8] : memref<8x16xf32, #tpu.memory_space<vmem>>, vector<8x16xf32>
    tpu.vector_store %arg4[%c0_7, %c0_8], %6 {strides = array<i32>} : memref<8x16xf32, #tpu.memory_space<vmem>>, vector<8x16xf32>,
    return
  }
  func.func @transform_0(%arg0: i32) -> (i32, i32) {
    %c0_i32 = arith.constant 0 : i32
    %c0_i32_0 = arith.constant 0 : i32
    return %arg0, %c0_i32 : i32, i32
  }
  func.func @transform_1(%arg0: i32) -> (i32, i32) {
    %c0_i32 = arith.constant 0 : i32
    %c0_i32_0 = arith.constant 0 : i32
    %c0_i32_1 = arith.constant 0 : i32
    return %c0_i32, %c0_i32_0 : i32, i32
  }
  func.func @transform_2(%arg0: i32) -> (i32, i32) {
    %c0_i32 = arith.constant 0 : i32
    %c0_i32_0 = arith.constant 0 : i32
    %c0_i32_1 = arith.constant 0 : i32
    return %c0_i32, %c0_i32_0 : i32, i32
  }
  func.func @transform_3(%arg0: i32) -> (i32, i32) {
    %c0_i32 = arith.constant 0 : i32
    %c0_i32_0 = arith.constant 0 : i32
    return %arg0, %c0_i32 : i32, i32
  }
}

</mosaic_0001>

<bundles_post_ra>
// kernel: mlp_forward.1
= control target key start
LH: loop header
LB: loop body
LE: loop exit
PB: predicated region body
PF: predicated region fallthrough
CT: control target
= control target key end

     0   :  { %v264_v1 = vmov 0.0   ;;  %vm265_vm0 = vmmov 0   ;;  %s331_s0 = inlined_call_operand.vmem [shape: f32[8,32], index: 0, kind: input, shape index: {}]   ;;  %s332_s1 = inlined_call_operand.vmem [shape: f32[32,64], index: 1, kind: input, shape index: {}]   ;;  %s333_s2 = inlined_call_operand.vmem [shape: f32[64,16], index: 2, kind: input, shape index: {}]   ;;  %s334_s3 = inlined_call_operand.hbm [shape: f32[8,16], index: 3, kind: output, shape index: {}]  }
   0x1   :  { %v19_v0 = vld [vmem:[%s332_s1 + $0x18] sm:$0xff]  ;;  %209 = vmatprep.subr.mxu0 %v264_v1  ;;  %v18_v2 = vld [vmem:[%s332_s1 + $0x10] sm:$0xff]  ;;  %217 = vmatprep.mubr.msk.f32.mxu0 %vm265_vm0, %v264_v1  ;;  %v17_v5 = vld [vmem:[%s332_s1 + $0x8] sm:$0xff] }
   0x2   :  { %v102_v3 = vld [vmem:[%s333_s2 + $0x38] sm:$0xff]  ;;  %210 = vmatpush3.msra.mxu0 %v19_v0  ;;  %220 = vmatprep.subr.mxu1 %v264_v1  ;;  %v101_v4 = vld [vmem:[%s333_s2 + $0x30] sm:$0xff] }
   0x3   :  { %211 = vmatprep.subr.mxu0 %v264_v1  ;;  %221 = vmatpush3.msra.mxu1 %v102_v3 }
   0x4   :  { %8 = vsyncpa [#allocation3], 0  ;;  %212 = vmatpush3.msra.mxu0 %v18_v2  ;;  %222 = vmatprep.subr.mxu1 %v264_v1  ;;  %v100_v6 = vld [vmem:[%s333_s2 + $0x28] sm:$0xff]  ;;  %v16_v7 = vld [vmem:[%s332_s1] sm:$0xff]  ;;  %vm20_vm1 = vcmask 261120   ;;  %vm103_vm2 = vcmask 523264  }
   0x5   :  { %213 = vmatprep.subr.mxu0 %v264_v1  ;;  %223 = vmatpush3.msra.mxu1 %v101_v4  ;;  %v15_v8 = vld [vmem:[%s331_s0] sm:$0xff]  ;;  %v98_v10 = vld [vmem:[%s333_s2 + $0x18] sm:$0xff]  ;;  %v97_v11 = vld [vmem:[%s333_s2 + $0x10] sm:$0xff]  ;;  %s266_s9 = smov [#allocation2]   ;;  %vm177_vm3 = vcmask 130048  }
   0x6   :  { %214 = vmatpush3.msra.mxu0 %v17_v5  ;;  %224 = vmatprep.subr.mxu1 %v264_v1  ;;  %v99_v9 = vld [vmem:[%s333_s2 + $0x20] sm:$0xff]  ;;  %v96_v12 = vld [vmem:[%s333_s2 + $0x8] sm:$0xff]  ;;  %s185_s10 = sshll.u32 %s266_s9, 4  ;;  %s186_s10 = int_to_ptr.vmem [resolvable:$true] %s185_s10 }
   0x7   :  { %215 = vmatprep.subr.mxu0 %v264_v1  ;;  %225 = vmatpush3.msra.mxu1 %v100_v6  ;;  %v95_v13 = vld [vmem:[%s333_s2] sm:$0xff]  ;;  %s242_s11 = scalar_lea.vmem %s186_s10, 128  ;;  %p247_p1 = scmp.lt.s32.totalorder %s186_s10, %s186_s10 }
   0x8   :  { %216 = vmatpush3.msra.mxu0 %v16_v7  ;;  %226 = vmatprep.subr.mxu1 %v264_v1  ;;  %p243_p0 = scmp.ne.s32.totalorder %s186_s10, %s242_s11  ;;  %p248_p2 = scmp.lt.s32.totalorder %s242_s11, %s242_s11 }
   0x9   :  { %218 = vmatmul.mubr.msk.f32.vlgmr.msra.gmra.mxu0 %vm20_vm1, %v15_v8  ;;  %227 = vmatpush3.msra.mxu1 %v99_v9 }
   0xa   :  { %228 = vmatprep.subr.mxu1 %v264_v1  ;;  %236 = vmatprep.mubr.msk.f32.mxu1 %vm265_vm0, %v264_v1  ;;  %p249_p3 = por %p248_p2, %p247_p1 }
   0xb   :  { %229 = vmatpush3.msra.mxu1 %v98_v10 }
   0xc   :  { %230 = vmatprep.subr.mxu1 %v264_v1  ;;  %p250_p4 = pnand %p249_p3, %p243_p0 }
   0xd   :  { %231 = vmatpush3.msra.mxu1 %v97_v11 }
   0xe   :  { %232 = vmatprep.subr.mxu1 %v264_v1 }
   0xf   :  { %233 = vmatpush3.msra.mxu1 %v96_v12 }
  0x10   :  { %234 = vmatprep.subr.mxu1 %v264_v1 }
  0x11   :  { %235 = vmatpush3.msra.mxu1 %v95_v13 }
  0xc9   :  { %v90_v14 = vpop.f32.mrf.mxu0 }
  0xca   :  { %v94_v15 = vmax.f32 %v90_v14, 0.0 }
  0xcb   :  { %v219_v16 = vpop.f32.mrf.mxu0 }
  0xcc   :  { %237 = vmatmul.mubr.msk.f32.vlgmr.msra.gmra.mxu1 %vm103_vm2, %v94_v15 }
 0x18c   :  { %v173_v17 = vpop.f32.mrf.mxu1 }
 0x18d   :  { %178 = vst.msk [vmem:[#allocation2] sm:$0xff] %vm177_vm3, %v173_v17 }
 0x18e   :  { %v238_v18 = vpop.f32.mrf.mxu1 }
 0x18f   :  { %253 = shalt.err (!%p250_p4)
}
 0x190   :  { %188 = dma.vmem_to_hbm [thread:$0]  %s186_s10, 128, %s334_s3, [#allocation3]  }
 0x191   :  { %262 = dma.done.wait [#allocation3], 128  }
 0x192   :  { %263 = vsyncadd [#allocation3], 4294967168 }
 0x193   :  { %192 = vsyncpa [#allocation3], 1 }

</bundles_post_ra>
